<compile_context>
chip_gen: v5e
topology: v5e:2x2
jax: 0.10.0
libtpu: 0.0.40
codegen_flags: <defaults>
</compile_context>

<pallas_src>
import functools

import jax
import jax.numpy as jnp
from jax.experimental import pallas as pl
from jax.experimental.pallas import tpu as pltpu


_OUT_FEATURES = 2


def _round_up(x, m):
    return ((x + m - 1) // m) * m


def _padded_bytes(shape, itemsize):
    """VMEM footprint of a 2-D operand with (8, 128) lane/sublane padding."""
    rows, cols = shape[-2], shape[-1]
    return _round_up(rows, 8) * _round_up(cols, 128) * itemsize


def _vmem_capacity_bytes():
    """Per-core VMEM capacity; conservative (v7x-sized) fallback."""
    try:
        info = pltpu.get_tpu_info()
        cap = getattr(info, "vmem_capacity_bytes", None)
        if cap:
            return int(cap)
    except Exception:
        pass
    return 64 << 20


def _pick_batch_tile(batch, d_in, resident_bytes, vmem_cap, *, max_tile=2048):
    """Largest batch tile whose double-buffered f32 x stream (+ in-kernel bf16
    copy) fits the VMEM budget, aligned for the MXU / (8,128) tiling."""
    d_pad = _round_up(d_in, 128)
    # Budget for the x tile: whatever is left after resident params (already
    # counted with 2 buffers) and activation/compiler headroom, capped at
    # 48 MiB (plenty to hit the HBM roofline on every generation).
    budget = vmem_cap - resident_bytes - (8 << 20)
    budget = max(2 << 20, min(budget, 48 << 20))
    # Per-row bytes: 2 buffers of f32 x + one in-kernel bf16 copy.
    tb = budget // (2 * d_pad * 4 + d_pad * 2)
    tb = int(max(8, min(max_tile, tb)))
    tb = (tb // 128) * 128 if tb >= 128 else (tb // 8) * 8
    tb = max(8, min(tb, _round_up(max(batch, 1), 8)))
    # Megacore: if the whole batch would land on a single grid step but is big
    # enough to split, halve the tile so both v7x TensorCores get work.
    if batch >= 256 and pl.cdiv(batch, tb) < 2:
        tb = max(128, min(tb, _round_up(pl.cdiv(batch, 2), 128)))
    return tb


def _dqn_kernel(x_ref, w1_ref, b1_ref, w2_ref, b2_ref,
                w3_ref, b3_ref, w4_ref, b4_ref, o_ref, *, matmul_dtype):
    # In-kernel cast of the MXU inputs (free VPU filler; kernel is HBM-bound).
    x = x_ref[...].astype(matmul_dtype)
    h = jnp.dot(x, w1_ref[...].astype(matmul_dtype),
                preferred_element_type=jnp.float32)
    h = jnp.maximum(h + b1_ref[...], 0.0)
    h = jnp.dot(h.astype(matmul_dtype), w2_ref[...].astype(matmul_dtype),
                preferred_element_type=jnp.float32)
    h = jnp.maximum(h + b2_ref[...], 0.0)
    h = jnp.dot(h.astype(matmul_dtype), w3_ref[...].astype(matmul_dtype),
                preferred_element_type=jnp.float32)
    h = jnp.maximum(h + b3_ref[...], 0.0)
    o = jnp.dot(h.astype(matmul_dtype), w4_ref[...].astype(matmul_dtype),
                preferred_element_type=jnp.float32)
    o_ref[...] = (o + b4_ref[...]).astype(o_ref.dtype)


def dqn_forward(x_nchw, params, *, batch_tile=None, matmul_dtype=jnp.bfloat16):
    """x_nchw: (B, 3, H, W) float32 -> (B, 2) float32 Q-values.

    matmul_dtype=jnp.bfloat16 feeds the MXU with bf16 (f32 accumulation);
    pass jnp.float32 for exact parity with a pure-f32 PyTorch DQN — the
    kernel is HBM-bandwidth-bound either way so this costs nothing.
    """
    B = x_nchw.shape[0]
    x = x_nchw.reshape(B, -1)          # torch flatten(start_dim=1); no-copy view
    D = x.shape[1]

    (w1, b1), (w2, b2), (w3, b3), (w4, b4) = params
    resident = [w1, b1, w2, b2, w3, b3, w4, b4]

    vmem_cap = _vmem_capacity_bytes()
    # Resident params sit in VMEM with 2 pipeline buffers each, lane-padded.
    resident_bytes = 2 * sum(_padded_bytes(a.shape, 4) for a in resident)

    tb = batch_tile if batch_tile is not None else _pick_batch_tile(
        B, D, resident_bytes, vmem_cap)
    n_tiles = pl.cdiv(B, tb)

    in_specs = (
        # Streamed, double-buffered x tile (native f32 straight from HBM).
        # TODO(synk): sweep pipeline_mode=pl.Buffered(3) here if DMA gaps show
        # in a trace; and pl.Buffered(1) on the resident specs for very large D.
        [pl.BlockSpec((tb, D), lambda i: (i, 0))]
        # Constant block index -> fetched once, VMEM-resident across steps.
        + [pl.BlockSpec(a.shape, lambda i: (0, 0)) for a in resident]
    )

    # Lane-padded VMEM accounting: streamed x + output (2 buffers each),
    # resident params (2 buffers, counted above), in-kernel bf16 x copy,
    # hidden activations, plus fixed headroom for compiler scratch.
    x_block_bytes = _padded_bytes((tb, D), 4)
    out_block_bytes = _padded_bytes((tb, _OUT_FEATURES), 4)
    act_bytes = _padded_bytes((tb, D), 2) + 6 * _padded_bytes((tb, 128), 4)
    vmem_bytes = min(vmem_cap,
                     2 * (x_block_bytes + out_block_bytes)
                     + resident_bytes + act_bytes + (8 << 20))

    flops = 2 * B * (D * 24 + 24 * 32 + 32 * 24 + 24 * _OUT_FEATURES)
    bytes_accessed = (B * D * x.dtype.itemsize
                      + sum(int(a.size) * a.dtype.itemsize for a in resident)
                      + B * _OUT_FEATURES * 4)

    kernel = functools.partial(_dqn_kernel, matmul_dtype=matmul_dtype)
    return pl.pallas_call(
        kernel,
        out_shape=jax.ShapeDtypeStruct((B, _OUT_FEATURES), jnp.float32),
        grid=(n_tiles,),
        in_specs=in_specs,
        out_specs=pl.BlockSpec((tb, _OUT_FEATURES), lambda i: (i, 0)),
        compiler_params=pltpu.CompilerParams(
            dimension_semantics=("parallel",),
            vmem_limit_bytes=int(vmem_bytes),
        ),
        cost_estimate=pl.CostEstimate(
            flops=flops, transcendentals=0, bytes_accessed=bytes_accessed),
    )(x, *resident)


def init_dqn_params(key, img_height, img_width):
    """Deterministic init mimicking PyTorch nn.Linear default (uniform ±1/sqrt(fan_in)).
    Weights stored as (in, out) so the kernel computes x @ W + b."""
    dims = [(img_height * img_width * 3, 24), (24, 32), (32, 24),
            (24, _OUT_FEATURES)]
    params = []
    for (fan_in, fan_out) in dims:
        key, kw, kb = jax.random.split(key, 3)
        bound = 1.0 / jnp.sqrt(fan_in)
        w = jax.random.uniform(kw, (fan_in, fan_out), jnp.float32, -bound, bound)
        b = jax.random.uniform(kb, (1, fan_out), jnp.float32, -bound, bound)
        params.append((w, b))
    return params


def _reference_forward(x_nchw, params, matmul_dtype=jnp.bfloat16):
    """Pure-JAX reference mirroring the kernel's MXU-input quantization."""
    h = x_nchw.reshape(x_nchw.shape[0], -1).astype(jnp.float32)
    for i, (w, b) in enumerate(params):
        hq = h.astype(matmul_dtype).astype(jnp.float32)
        wq = w.astype(matmul_dtype).astype(jnp.float32)
        h = jnp.dot(hq, wq, precision=jax.lax.Precision.HIGHEST) + b
        if i < len(params) - 1:
            h = jnp.maximum(h, 0.0)
    return h


if __name__ == "__main__":
    key = jax.random.PRNGKey(0)
    k_x, k_p = jax.random.split(key)

    B, C, H, W = 2, 3, 16, 16
    x = jax.random.uniform(k_x, (B, C, H, W), jnp.float32)
    params = init_dqn_params(k_p, H, W)

    out = jax.block_until_ready(dqn_forward(x, params))
    ref = _reference_forward(x, params)

    assert out.shape == (B, _OUT_FEATURES)
    assert jnp.allclose(out, ref, atol=1e-3, rtol=1e-3), (
        f"max abs err = {jnp.max(jnp.abs(out - ref))}")

    print("KERNEL_OK")
</pallas_src>

<mosaic_0001>
module attributes {stable_mosaic.version = 11 : i64} {
  func.func @_dqn_kernel(%arg0: i32, %arg1: memref<8x768xf32, #tpu.memory_space<vmem>>, %arg2: memref<768x24xf32, #tpu.memory_space<vmem>>, %arg3: memref<1x24xf32, #tpu.memory_space<vmem>>, %arg4: memref<24x32xf32, #tpu.memory_space<vmem>>, %arg5: memref<1x32xf32, #tpu.memory_space<vmem>>, %arg6: memref<32x24xf32, #tpu.memory_space<vmem>>, %arg7: memref<1x24xf32, #tpu.memory_space<vmem>>, %arg8: memref<24x2xf32, #tpu.memory_space<vmem>>, %arg9: memref<1x2xf32, #tpu.memory_space<vmem>>, %arg10: memref<8x2xf32, #tpu.memory_space<vmem>>) attributes {dimension_semantics = [#tpu.dimension_semantics<parallel>], iteration_bounds = array<i64: 1>, scalar_prefetch = 0 : i64, scratch_operands = 0 : i64, tpu.core_type = #tpu.core_type<tc>, window_params = [{transform_indices = @transform_0, window_bounds = array<i64: 8, 768>}, {pipeline_mode = #tpu.pipeline_mode<synchronous>, transform_indices = @transform_1, window_bounds = array<i64: 768, 24>}, {pipeline_mode = #tpu.pipeline_mode<synchronous>, transform_indices = @transform_2, window_bounds = array<i64: 1, 24>}, {pipeline_mode = #tpu.pipeline_mode<synchronous>, transform_indices = @transform_3, window_bounds = array<i64: 24, 32>}, {pipeline_mode = #tpu.pipeline_mode<synchronous>, transform_indices = @transform_4, window_bounds = array<i64: 1, 32>}, {pipeline_mode = #tpu.pipeline_mode<synchronous>, transform_indices = @transform_5, window_bounds = array<i64: 32, 24>}, {pipeline_mode = #tpu.pipeline_mode<synchronous>, transform_indices = @transform_6, window_bounds = array<i64: 1, 24>}, {pipeline_mode = #tpu.pipeline_mode<synchronous>, transform_indices = @transform_7, window_bounds = array<i64: 24, 2>}, {pipeline_mode = #tpu.pipeline_mode<synchronous>, transform_indices = @transform_8, window_bounds = array<i64: 1, 2>}, {transform_indices = @transform_9, window_bounds = array<i64: 8, 2>}]} {
    %c0 = arith.constant 0 : index
    %c0_0 = arith.constant 0 : index
    %0 = vector.load %arg1[%c0, %c0_0] : memref<8x768xf32, #tpu.memory_space<vmem>>, vector<8x768xf32>
    %1 = arith.truncf %0 : vector<8x768xf32> to vector<8x768xbf16>
    %c0_1 = arith.constant 0 : index
    %c0_2 = arith.constant 0 : index
    %2 = vector.load %arg2[%c0_1, %c0_2] : memref<768x24xf32, #tpu.memory_space<vmem>>, vector<768x24xf32>
    %3 = arith.truncf %2 : vector<768x24xf32> to vector<768x24xbf16>
    %cst = arith.constant dense<0.000000e+00> : vector<8x24xf32>
    %4 = tpu.matmul %1, %3, %cst {dimension_numbers = #tpu.dot_dimension_numbers<[1], [0], [0], [1], [0, 0, 1, 1], [], []>} : vector<8x768xbf16>, vector<768x24xbf16>, vector<8x24xf32> -> vector<8x24xf32>
    %c0_3 = arith.constant 0 : index
    %c0_4 = arith.constant 0 : index
    %5 = vector.load %arg3[%c0_3, %c0_4] : memref<1x24xf32, #tpu.memory_space<vmem>>, vector<1x24xf32>
    %6 = vector.broadcast %5 : vector<1x24xf32> to vector<8x24xf32>
    %7 = arith.addf %4, %6 : vector<8x24xf32>
    %cst_5 = arith.constant 0.000000e+00 : f32
    %8 = vector.broadcast %cst_5 : f32 to vector<8x24xf32>
    %9 = arith.maximumf %7, %8 : vector<8x24xf32>
    %10 = arith.truncf %9 : vector<8x24xf32> to vector<8x24xbf16>
    %c0_6 = arith.constant 0 : index
    %c0_7 = arith.constant 0 : index
    %11 = vector.load %arg4[%c0_6, %c0_7] : memref<24x32xf32, #tpu.memory_space<vmem>>, vector<24x32xf32>
    %12 = arith.truncf %11 : vector<24x32xf32> to vector<24x32xbf16>
    %cst_8 = arith.constant dense<0.000000e+00> : vector<8x32xf32>
    %13 = tpu.matmul %10, %12, %cst_8 {dimension_numbers = #tpu.dot_dimension_numbers<[1], [0], [0], [1], [0, 0, 1, 1], [], []>} : vector<8x24xbf16>, vector<24x32xbf16>, vector<8x32xf32> -> vector<8x32xf32>
    %c0_9 = arith.constant 0 : index
    %c0_10 = arith.constant 0 : index
    %14 = vector.load %arg5[%c0_9, %c0_10] : memref<1x32xf32, #tpu.memory_space<vmem>>, vector<1x32xf32>
    %15 = vector.broadcast %14 : vector<1x32xf32> to vector<8x32xf32>
    %16 = arith.addf %13, %15 : vector<8x32xf32>
    %cst_11 = arith.constant 0.000000e+00 : f32
    %17 = vector.broadcast %cst_11 : f32 to vector<8x32xf32>
    %18 = arith.maximumf %16, %17 : vector<8x32xf32>
    %19 = arith.truncf %18 : vector<8x32xf32> to vector<8x32xbf16>
    %c0_12 = arith.constant 0 : index
    %c0_13 = arith.constant 0 : index
    %20 = vector.load %arg6[%c0_12, %c0_13] : memref<32x24xf32, #tpu.memory_space<vmem>>, vector<32x24xf32>
    %21 = arith.truncf %20 : vector<32x24xf32> to vector<32x24xbf16>
    %cst_14 = arith.constant dense<0.000000e+00> : vector<8x24xf32>
    %22 = tpu.matmul %19, %21, %cst_14 {dimension_numbers = #tpu.dot_dimension_numbers<[1], [0], [0], [1], [0, 0, 1, 1], [], []>} : vector<8x32xbf16>, vector<32x24xbf16>, vector<8x24xf32> -> vector<8x24xf32>
    %c0_15 = arith.constant 0 : index
    %c0_16 = arith.constant 0 : index
    %23 = vector.load %arg7[%c0_15, %c0_16] : memref<1x24xf32, #tpu.memory_space<vmem>>, vector<1x24xf32>
    %24 = vector.broadcast %23 : vector<1x24xf32> to vector<8x24xf32>
    %25 = arith.addf %22, %24 : vector<8x24xf32>
    %cst_17 = arith.constant 0.000000e+00 : f32
    %26 = vector.broadcast %cst_17 : f32 to vector<8x24xf32>
    %27 = arith.maximumf %25, %26 : vector<8x24xf32>
    %28 = arith.truncf %27 : vector<8x24xf32> to vector<8x24xbf16>
    %c0_18 = arith.constant 0 : index
    %c0_19 = arith.constant 0 : index
    %29 = vector.load %arg8[%c0_18, %c0_19] : memref<24x2xf32, #tpu.memory_space<vmem>>, vector<24x2xf32>
    %30 = arith.truncf %29 : vector<24x2xf32> to vector<24x2xbf16>
    %cst_20 = arith.constant dense<0.000000e+00> : vector<8x2xf32>
    %31 = tpu.matmul %28, %30, %cst_20 {dimension_numbers = #tpu.dot_dimension_numbers<[1], [0], [0], [1], [0, 0, 1, 1], [], []>} : vector<8x24xbf16>, vector<24x2xbf16>, vector<8x2xf32> -> vector<8x2xf32>
    %c0_21 = arith.constant 0 : index
    %c0_22 = arith.constant 0 : index
    %32 = vector.load %arg9[%c0_21, %c0_22] : memref<1x2xf32, #tpu.memory_space<vmem>>, vector<1x2xf32>
    %33 = vector.broadcast %32 : vector<1x2xf32> to vector<8x2xf32>
    %34 = arith.addf %31, %33 : vector<8x2xf32>
    %c0_23 = arith.constant 0 : index
    %c0_24 = arith.constant 0 : index
    %35 = vector.load %arg10[%c0_23, %c0_24] : memref<8x2xf32, #tpu.memory_space<vmem>>, vector<8x2xf32>
    tpu.vector_store %arg10[%c0_23, %c0_24], %34 {strides = array<i32>} : memref<8x2xf32, #tpu.memory_space<vmem>>, vector<8x2xf32>,
    return
  }
  func.func @transform_0(%arg0: i32) -> (i32, i32) {
    %c0_i32 = arith.constant 0 : i32
    %c0_i32_0 = arith.constant 0 : i32
    return %arg0, %c0_i32 : i32, i32
  }
  func.func @transform_1(%arg0: i32) -> (i32, i32) {
    %c0_i32 = arith.constant 0 : i32
    %c0_i32_0 = arith.constant 0 : i32
    %c0_i32_1 = arith.constant 0 : i32
    return %c0_i32, %c0_i32_0 : i32, i32
  }
  func.func @transform_2(%arg0: i32) -> (i32, i32) {
    %c0_i32 = arith.constant 0 : i32
    %c0_i32_0 = arith.constant 0 : i32
    %c0_i32_1 = arith.constant 0 : i32
    return %c0_i32, %c0_i32_0 : i32, i32
  }
  func.func @transform_3(%arg0: i32) -> (i32, i32) {
    %c0_i32 = arith.constant 0 : i32
    %c0_i32_0 = arith.constant 0 : i32
    %c0_i32_1 = arith.constant 0 : i32
    return %c0_i32, %c0_i32_0 : i32, i32
  }
  func.func @transform_4(%arg0: i32) -> (i32, i32) {
    %c0_i32 = arith.constant 0 : i32
    %c0_i32_0 = arith.constant 0 : i32
    %c0_i32_1 = arith.constant 0 : i32
    return %c0_i32, %c0_i32_0 : i32, i32
  }
  func.func @transform_5(%arg0: i32) -> (i32, i32) {
    %c0_i32 = arith.constant 0 : i32
    %c0_i32_0 = arith.constant 0 : i32
    %c0_i32_1 = arith.constant 0 : i32
    return %c0_i32, %c0_i32_0 : i32, i32
  }
  func.func @transform_6(%arg0: i32) -> (i32, i32) {
    %c0_i32 = arith.constant 0 : i32
    %c0_i32_0 = arith.constant 0 : i32
    %c0_i32_1 = arith.constant 0 : i32
    return %c0_i32, %c0_i32_0 : i32, i32
  }
  func.func @transform_7(%arg0: i32) -> (i32, i32) {
    %c0_i32 = arith.constant 0 : i32
    %c0_i32_0 = arith.constant 0 : i32
    %c0_i32_1 = arith.constant 0 : i32
    return %c0_i32, %c0_i32_0 : i32, i32
  }
  func.func @transform_8(%arg0: i32) -> (i32, i32) {
    %c0_i32 = arith.constant 0 : i32
    %c0_i32_0 = arith.constant 0 : i32
    %c0_i32_1 = arith.constant 0 : i32
    return %c0_i32, %c0_i32_0 : i32, i32
  }
  func.func @transform_9(%arg0: i32) -> (i32, i32) {
    %c0_i32 = arith.constant 0 : i32
    %c0_i32_0 = arith.constant 0 : i32
    return %arg0, %c0_i32 : i32, i32
  }
}

</mosaic_0001>

<bundles_post_ra>
// kernel: tpu_custom_call.1
= control target key start
LH: loop header
LB: loop body
LE: loop exit
PB: predicated region body
PF: predicated region fallthrough
CT: control target
= control target key end

     0   :  { %14 = vsyncpa [#allocation3], 0  ;;  %vm324_vm0 = vcmask 1043456   ;;  %vm320_vm1 = vcmask 195584   ;;  %vm353_vm2 = vcmask 261120   ;;  %vm400_vm3 = vcmask 15360   ;;  %s868_s0 = inlined_call_operand.vmem [shape: f32[2,768], index: 0, kind: input, shape index: {}]   ;;  %s869_s1 = inlined_call_operand.vmem [shape: f32[768,24], index: 1, kind: input, shape index: {}]   ;;  %s870_s2 = inlined_call_operand.vmem [shape: f32[1,24], index: 2, kind: input, shape index: {}]   ;;  %s871_s3 = inlined_call_operand.vmem [shape: f32[24,32], index: 3, kind: input, shape index: {}]   ;;  %s872_s4 = inlined_call_operand.vmem [shape: f32[1,32], index: 4, kind: input, shape index: {}]   ;;  %s873_s5 = inlined_call_operand.vmem [shape: f32[32,24], index: 5, kind: input, shape index: {}]   ;;  %s874_s6 = inlined_call_operand.vmem [shape: f32[1,24], index: 6, kind: input, shape index: {}]   ;;  %s875_s7 = inlined_call_operand.vmem [shape: f32[24,2], index: 7, kind: input, shape index: {}]   ;;  %s876_s8 = inlined_call_operand.vmem [shape: f32[1,2], index: 8, kind: input, shape index: {}]   ;;  %s877_s9 = inlined_call_operand.hbm [shape: f32[2,2], index: 9, kind: output, shape index: {}]  }
   0x1   :  { %v97_v0 = vld [vmem:[%s869_s1 + $0x70] sm:$0xff]  ;;  %v98_v1 = vld [vmem:[%s869_s1 + $0x78] sm:$0xff]  ;;  %v95_v5 = vld [vmem:[%s869_s1 + $0x60] sm:$0xff] }
   0x2   :  { %v186_v2 = vpack.c.bf16 %v98_v1, %v97_v0  ;;  %v113_v3 = vld [vmem:[%s869_s1 + $0xf0] sm:$0xff]  ;;  %v114_v4 = vld [vmem:[%s869_s1 + $0xf8] sm:$0xff]  ;;  %v96_v7 = vld [vmem:[%s869_s1 + $0x68] sm:$0xff] }
   0x3   :  { %v194_v6 = vpack.c.bf16 %v114_v4, %v113_v3  ;;  %v111_v8 = vld [vmem:[%s869_s1 + $0xe0] sm:$0xff]  ;;  %v112_v9 = vld [vmem:[%s869_s1 + $0xe8] sm:$0xff]  ;;  %v185_v10 = vpack.c.bf16 %v96_v7, %v95_v5  ;;  %v93_v11 = vld [vmem:[%s869_s1 + $0x50] sm:$0xff] }
   0x4   :  { %231 = vmatpush.bf16.msra.mxu0 %v186_v2  ;;  %v193_v12 = vpack.c.bf16 %v112_v9, %v111_v8  ;;  %v94_v13 = vld [vmem:[%s869_s1 + $0x58] sm:$0xff]  ;;  %v129_v14 = vld [vmem:[%s869_s1 + $0x170] sm:$0xff]  ;;  %v91_v22 = vld [vmem:[%s869_s1 + $0x40] sm:$0xff] }
   0x5   :  { %244 = vmatpush.bf16.msra.mxu1 %v194_v6  ;;  %v130_v15 = vld [vmem:[%s869_s1 + $0x178] sm:$0xff]  ;;  %v109_v16 = vld [vmem:[%s869_s1 + $0xd0] sm:$0xff]  ;;  %v184_v21 = vpack.c.bf16 %v94_v13, %v93_v11  ;;  %v127_v24 = vld [vmem:[%s869_s1 + $0x160] sm:$0xff] }
   0x6   :  { %v110_v17 = vld [vmem:[%s869_s1 + $0xd8] sm:$0xff]  ;;  %v202_v18 = vpack.c.bf16 %v130_v15, %v129_v14  ;;  %v145_v19 = vld [vmem:[%s869_s1 + $0x1f0] sm:$0xff]  ;;  %v128_v25 = vld [vmem:[%s869_s1 + $0x168] sm:$0xff] }
   0x7   :  { %v146_v20 = vld [vmem:[%s869_s1 + $0x1f8] sm:$0xff]  ;;  %v192_v26 = vpack.c.bf16 %v110_v17, %v109_v16  ;;  %v92_v27 = vld [vmem:[%s869_s1 + $0x48] sm:$0xff]  ;;  %v107_v28 = vld [vmem:[%s869_s1 + $0xc0] sm:$0xff]  ;;  %v201_v30 = vpack.c.bf16 %v128_v25, %v127_v24 }
   0x8   :  { %232 = vmatpush.bf16.msra.mxu0 %v185_v10  ;;  %257 = vmatpush.bf16.msra.mxu2 %v202_v18  ;;  %v210_v23 = vpack.c.bf16 %v146_v20, %v145_v19  ;;  %v108_v29 = vld [vmem:[%s869_s1 + $0xc8] sm:$0xff]  ;;  %v143_v31 = vld [vmem:[%s869_s1 + $0x1e0] sm:$0xff]  ;;  %v125_v33 = vld [vmem:[%s869_s1 + $0x150] sm:$0xff]  ;;  %v183_v36 = vpack.c.bf16 %v92_v27, %v91_v22 }
   0x9   :  { %245 = vmatpush.bf16.msra.mxu1 %v193_v12  ;;  %v144_v32 = vld [vmem:[%s869_s1 + $0x1e8] sm:$0xff]  ;;  %v126_v35 = vld [vmem:[%s869_s1 + $0x158] sm:$0xff]  ;;  %v89_v37 = vld [vmem:[%s869_s1 + $0x30] sm:$0xff]  ;;  %v191_v41 = vpack.c.bf16 %v108_v29, %v107_v28 }
   0xa   :  { %270 = vmatpush.bf16.msra.mxu3 %v210_v23  ;;  %v209_v34 = vpack.c.bf16 %v144_v32, %v143_v31  ;;  %v90_v38 = vld [vmem:[%s869_s1 + $0x38] sm:$0xff]  ;;  %v200_v39 = vpack.c.bf16 %v126_v35, %v125_v33  ;;  %v141_v40 = vld [vmem:[%s869_s1 + $0x1d0] sm:$0xff]  ;;  %v123_v43 = vld [vmem:[%s869_s1 + $0x140] sm:$0xff] }
   0xb   :  { %v142_v42 = vld [vmem:[%s869_s1 + $0x1d8] sm:$0xff]  ;;  %v124_v44 = vld [vmem:[%s869_s1 + $0x148] sm:$0xff]  ;;  %v105_v45 = vld [vmem:[%s869_s1 + $0xb0] sm:$0xff]  ;;  %v182_v50 = vpack.c.bf16 %v90_v38, %v89_v37 }
   0xc   :  { %233 = vmatpush.bf16.msra.mxu0 %v184_v21  ;;  %258 = vmatpush.bf16.msra.mxu2 %v201_v30  ;;  %v106_v46 = vld [vmem:[%s869_s1 + $0xb8] sm:$0xff]  ;;  %v208_v47 = vpack.c.bf16 %v142_v42, %v141_v40  ;;  %v139_v48 = vld [vmem:[%s869_s1 + $0x1c0] sm:$0xff]  ;;  %v140_v49 = vld [vmem:[%s869_s1 + $0x1c8] sm:$0xff]  ;;  %v199_v52 = vpack.c.bf16 %v124_v44, %v123_v43 }
   0xd   :  { %246 = vmatpush.bf16.msra.mxu1 %v192_v26  ;;  %v87_v51 = vld [vmem:[%s869_s1 + $0x20] sm:$0xff]  ;;  %v190_v53 = vpack.c.bf16 %v106_v46, %v105_v45  ;;  %v88_v54 = vld [vmem:[%s869_s1 + $0x28] sm:$0xff]  ;;  %v121_v55 = vld [vmem:[%s869_s1 + $0x130] sm:$0xff]  ;;  %v207_v59 = vpack.c.bf16 %v140_v49, %v139_v48 }
   0xe   :  { %271 = vmatpush.bf16.msra.mxu3 %v209_v34  ;;  %v122_v56 = vld [vmem:[%s869_s1 + $0x138] sm:$0xff]  ;;  %v103_v57 = vld [vmem:[%s869_s1 + $0xa0] sm:$0xff]  ;;  %v104_v58 = vld [vmem:[%s869_s1 + $0xa8] sm:$0xff]  ;;  %v181_v62 = vpack.c.bf16 %v88_v54, %v87_v51 }
   0xf   :  { %v137_v60 = vld [vmem:[%s869_s1 + $0x1b0] sm:$0xff]  ;;  %v138_v61 = vld [vmem:[%s869_s1 + $0x1b8] sm:$0xff]  ;;  %v198_v0 = vpack.c.bf16 %v122_v56, %v121_v55  ;;  %v189_v1 = vpack.c.bf16 %v104_v58, %v103_v57  ;;  %v119_v3 = vld [vmem:[%s869_s1 + $0x120] sm:$0xff] }
  0x10   :  { %234 = vmatpush.bf16.msra.mxu0 %v183_v36  ;;  %259 = vmatpush.bf16.msra.mxu2 %v200_v39  ;;  %v85_v63 = vld [vmem:[%s869_s1 + $0x10] sm:$0xff]  ;;  %v86_v2 = vld [vmem:[%s869_s1 + $0x18] sm:$0xff]  ;;  %v120_v4 = vld [vmem:[%s869_s1 + $0x128] sm:$0xff]  ;;  %v206_v7 = vpack.c.bf16 %v138_v61, %v137_v60 }
  0x11   :  { %247 = vmatpush.bf16.msra.mxu1 %v191_v41  ;;  %v101_v5 = vld [vmem:[%s869_s1 + $0x90] sm:$0xff]  ;;  %v102_v6 = vld [vmem:[%s869_s1 + $0x98] sm:$0xff]  ;;  %v135_v8 = vld [vmem:[%s869_s1 + $0x1a0] sm:$0xff]  ;;  %v180_v14 = vpack.c.bf16 %v86_v2, %v85_v63  ;;  %v197_v16 = vpack.c.bf16 %v120_v4, %v119_v3 }
  0x12   :  { %272 = vmatpush.bf16.msra.mxu3 %v208_v47  ;;  %v83_v9 = vld [vmem:[%s869_s1] sm:$0xff]  ;;  %v84_v10 = vld [vmem:[%s869_s1 + $0x8] sm:$0xff]  ;;  %v38_v17 = vld [vmem:[%s868_s0 + $0x18] sm:$0xff]  ;;  %v188_v19 = vpack.c.bf16 %v102_v6, %v101_v5 }
  0x13   :  { %v136_v11 = vld [vmem:[%s869_s1 + $0x1a8] sm:$0xff]  ;;  %v34_v12 = vld [vmem:[%s868_s0] sm:$0xff]  ;;  %v117_v21 = vld [vmem:[%s869_s1 + $0x110] sm:$0xff]  ;;  %54 = vst [vmem:[#allocation1 + $0x2] ss:$4 sm:$0xff] %v38_v17  ;;  %v179_v30 = vpack.c.bf16 %v84_v10, %v83_v9 }
  0x14   :  { %235 = vmatpush.bf16.msra.mxu0 %v182_v50  ;;  %260 = vmatpush.bf16.msra.mxu2 %v199_v52  ;;  %v36_v13 = vld [vmem:[%s868_s0 + $0xc] sm:$0xff]  ;;  %v99_v15 = vld [vmem:[%s869_s1 + $0x80] sm:$0xff]  ;;  %50 = vst [vmem:[#allocation1] ss:$4 sm:$0xff] %v34_v12  ;;  %v118_v22 = vld [vmem:[%s869_s1 + $0x118] sm:$0xff]  ;;  %v205_v26 = vpack.c.bf16 %v136_v11, %v135_v8 }
  0x15   :  { %248 = vmatpush.bf16.msra.mxu1 %v190_v53  ;;  %v40_v18 = vld [vmem:[%s868_s0 + $0x24] sm:$0xff]  ;;  %52 = vst [vmem:[#allocation1 + $0x1] ss:$4 sm:$0xff] %v36_v13  ;;  %v161_v23 = vld [vmem:[%s869_s1 + $0x270] sm:$0xff]  ;;  %v162_v24 = vld [vmem:[%s869_s1 + $0x278] sm:$0xff]  ;;  %v196_v31 = vpack.c.bf16 %v118_v22, %v117_v21 }
  0x16   :  { %273 = vmatpush.bf16.msra.mxu3 %v207_v59  ;;  %v100_v20 = vld [vmem:[%s869_s1 + $0x88] sm:$0xff]  ;;  %v177_v25 = vld [vmem:[%s869_s1 + $0x2f0] sm:$0xff]  ;;  %v178_v27 = vld [vmem:[%s869_s1 + $0x2f8] sm:$0xff]  ;;  %56 = vst [vmem:[#allocation1 + $0x3] ss:$4 sm:$0xff] %v40_v18  ;;  %v218_v33 = vpack.c.bf16 %v162_v24, %v161_v23 }
  0x17   :  { %v133_v28 = vld [vmem:[%s869_s1 + $0x190] sm:$0xff]  ;;  %v134_v29 = vld [vmem:[%s869_s1 + $0x198] sm:$0xff]  ;;  %v187_v32 = vpack.c.bf16 %v100_v20, %v99_v15  ;;  %v115_v34 = vld [vmem:[%s869_s1 + $0x100] sm:$0xff]  ;;  %v226_v36 = vpack.c.bf16 %v178_v27, %v177_v25 }
  0x18   :  { %236 = vmatpush.bf16.msra.mxu0 %v181_v62  ;;  %261 = vmatpush.bf16.msra.mxu2 %v198_v0  ;;  %v116_v35 = vld [vmem:[%s869_s1 + $0x108] sm:$0xff]  ;;  %v159_v37 = vld [vmem:[%s869_s1 + $0x260] sm:$0xff]  ;;  %v204_v39 = vpack.c.bf16 %v134_v29, %v133_v28  ;;  %v157_v42 = vld [vmem:[%s869_s1 + $0x250] sm:$0xff] }
  0x19   :  { %249 = vmatpush.bf16.msra.mxu1 %v189_v1  ;;  %v160_v38 = vld [vmem:[%s869_s1 + $0x268] sm:$0xff]  ;;  %v175_v40 = vld [vmem:[%s869_s1 + $0x2e0] sm:$0xff]  ;;  %v195_v43 = vpack.c.bf16 %v116_v35, %v115_v34  ;;  %v158_v47 = vld [vmem:[%s869_s1 + $0x258] sm:$0xff] }
  0x1a   :  { %274 = vmatpush.bf16.msra.mxu3 %v206_v7  ;;  %v176_v41 = vld [vmem:[%s869_s1 + $0x2e8] sm:$0xff]  ;;  %v131_v44 = vld [vmem:[%s869_s1 + $0x180] sm:$0xff]  ;;  %v217_v46 = vpack.c.bf16 %v160_v38, %v159_v37  ;;  %v173_v48 = vld [vmem:[%s869_s1 + $0x2d0] sm:$0xff]  ;;  %v216_v62 = vpack.c.bf16 %v158_v47, %v157_v42 }
  0x1b   :  { %v132_v45 = vld [vmem:[%s869_s1 + $0x188] sm:$0xff]  ;;  %v174_v49 = vld [vmem:[%s869_s1 + $0x2d8] sm:$0xff]  ;;  %v225_v50 = vpack.c.bf16 %v176_v41, %v175_v40  ;;  %v155_v58 = vld [vmem:[%s869_s1 + $0x240] sm:$0xff] }
  0x1c   :  { %237 = vmatpush.bf16.msra.mxu0 %v180_v14  ;;  %262 = vmatpush.bf16.msra.mxu2 %v197_v16  ;;  %v203_v55 = vpack.c.bf16 %v132_v45, %v131_v44  ;;  %v156_v59 = vld [vmem:[%s869_s1 + $0x248] sm:$0xff]  ;;  %v171_v63 = vld [vmem:[%s869_s1 + $0x2c0] sm:$0xff]  ;;  %v37_v1 = vld [vmem:[%s868_s0 + $0x14] sm:$0xf]  ;;  %v224_v3 = vpack.c.bf16 %v174_v49, %v173_v48 }
  0x1d   :  { %250 = vmatpush.bf16.msra.mxu1 %v188_v19  ;;  %v65_v51 = vld.sshfl [vmem:[#allocation1] sm:$0xff pattern:$0x73625140]  ;;  %v66_v52 = vld.sshfl [vmem:[#allocation1 + $0x8] sm:$0xff pattern:$0x73625140]  ;;  %v215_v6 = vpack.c.bf16 %v156_v59, %v155_v58 }
  0x1e   :  { %275 = vmatpush.bf16.msra.mxu3 %v205_v26  ;;  %v77_v53 = vpack.c.bf16 %v65_v51, %v65_v51  ;;  %v78_v54 = vpack.c.bf16 %v66_v52, %v66_v52  ;;  %v67_v56 = vld.sshfl [vmem:[#allocation1 + $0x10] sm:$0xff pattern:$0x73625140]  ;;  %v68_v57 = vld.sshfl [vmem:[#allocation1 + $0x18] sm:$0xff pattern:$0x73625140] }
  0x1f   :  { %v79_v60 = vpack.c.bf16 %v67_v56, %v67_v56  ;;  %v35_v61 = vld [vmem:[%s868_s0 + $0x8] sm:$0xf]  ;;  %v39_v2 = vld [vmem:[%s868_s0 + $0x20] sm:$0xf]  ;;  %v80_v4 = vpack.c.bf16 %v68_v57, %v68_v57  ;;  %v41_v5 = vld [vmem:[%s868_s0 + $0x2c] sm:$0xf] }
  0x20   :  { %238 = vmatpush.bf16.msra.mxu0 %v179_v30  ;;  %263 = vmatpush.bf16.msra.mxu2 %v196_v31  ;;  %v172_v0 = vld [vmem:[%s869_s1 + $0x2c8] sm:$0xff]  ;;  %58 = vst [vmem:[#allocation1 + $0x20] ss:$4 sm:$0xff] %v35_v61  ;;  %v153_v8 = vld [vmem:[%s869_s1 + $0x230] sm:$0xff]  ;;  %v154_v9 = vld [vmem:[%s869_s1 + $0x238] sm:$0xff] }
  0x21   :  { %251 = vmatpush.bf16.msra.mxu1 %v187_v32  ;;  %60 = vst [vmem:[#allocation1 + $0x21] ss:$4 sm:$0xff] %v37_v1  ;;  %v223_v7 = vpack.c.bf16 %v172_v0, %v171_v63  ;;  %v169_v10 = vld [vmem:[%s869_s1 + $0x2b0] sm:$0xff]  ;;  %v170_v11 = vld [vmem:[%s869_s1 + $0x2b8] sm:$0xff]  ;;  %v214_v12 = vpack.c.bf16 %v154_v9, %v153_v8  ;;  %v151_v14 = vld [vmem:[%s869_s1 + $0x220] sm:$0xff] }
  0x22   :  { %276 = vmatpush.bf16.msra.mxu3 %v204_v39  ;;  %62 = vst [vmem:[#allocation1 + $0x22] ss:$4 sm:$0xff] %v39_v2  ;;  %v222_v13 = vpack.c.bf16 %v170_v11, %v169_v10  ;;  %v152_v15 = vld [vmem:[%s869_s1 + $0x228] sm:$0xff]  ;;  %v167_v16 = vld [vmem:[%s869_s1 + $0x2a0] sm:$0xff]  ;;  %v149_v20 = vld [vmem:[%s869_s1 + $0x210] sm:$0xff] }
  0x23   :  { %239 = vmatmul.bf16.vlgmr.msra.gmra.mxu0 %v77_v53  ;;  %64 = vst [vmem:[#allocation1 + $0x23] ss:$4 sm:$0xff] %v41_v5  ;;  %v168_v17 = vld [vmem:[%s869_s1 + $0x2a8] sm:$0xff]  ;;  %v213_v18 = vpack.c.bf16 %v152_v15, %v151_v14  ;;  %v150_v21 = vld [vmem:[%s869_s1 + $0x218] sm:$0xff]  ;;  %v165_v22 = vld [vmem:[%s869_s1 + $0x290] sm:$0xff] }
  0x24   :  { %283 = vmatpush.bf16.msrb.mxu0 %v218_v33  ;;  %264 = vmatpush.bf16.msra.mxu2 %v195_v43  ;;  %v221_v19 = vpack.c.bf16 %v168_v17, %v167_v16  ;;  %v166_v23 = vld [vmem:[%s869_s1 + $0x298] sm:$0xff]  ;;  %v212_v24 = vpack.c.bf16 %v150_v21, %v149_v20  ;;  %v147_v26 = vld [vmem:[%s869_s1 + $0x200] sm:$0xff]  ;;  %v148_v27 = vld [vmem:[%s869_s1 + $0x208] sm:$0xff] }
  0x25   :  { %296 = vmatpush.bf16.msrb.mxu1 %v226_v36  ;;  %v220_v25 = vpack.c.bf16 %v166_v23, %v165_v22  ;;  %v163_v28 = vld [vmem:[%s869_s1 + $0x280] sm:$0xff]  ;;  %v164_v29 = vld [vmem:[%s869_s1 + $0x288] sm:$0xff]  ;;  %v211_v30 = vpack.c.bf16 %v148_v27, %v147_v26  ;;  %v313_v36 = vld [vmem:[%s871_s3 + $0x10] sm:$0xff] }
  0x26   :  { %252 = vmatmul.bf16.vlgmr.msra.gmra.mxu1 %v78_v54  ;;  %277 = vmatpush.bf16.msra.mxu3 %v203_v55  ;;  %v219_v32 = vpack.c.bf16 %v164_v29, %v163_v28  ;;  %v315_v37 = vpack.c.bf16 %v313_v36, %v313_v36  ;;  %v374_v39 = vld [vmem:[%s875_s7 + $0x10] sm:$0xff]  ;;  %v311_v41 = vld [vmem:[%s871_s3] sm:$0xff]  ;;  %v312_v42 = vld [vmem:[%s871_s3 + $0x8] sm:$0xff] }
  0x27   :  { %265 = vmatmul.bf16.vlgmr.msra.gmra.mxu2 %v79_v60  ;;  %v376_v40 = vpack.c.bf16 %v374_v39, %v374_v39  ;;  %v314_v45 = vpack.c.bf16 %v312_v42, %v311_v41  ;;  %v345_v47 = vld [vmem:[%s873_s5 + $0x10] sm:$0xff]  ;;  %v346_v48 = vld [vmem:[%s873_s5 + $0x18] sm:$0xff]  ;;  %v343_v49 = vld [vmem:[%s873_s5] sm:$0xff] }
  0x28   :  { %284 = vmatpush.bf16.msrb.mxu0 %v217_v46  ;;  %v326_v38 = vsel %vm324_vm0, %v315_v37, 0  ;;  %v344_v51 = vld [vmem:[%s873_s5 + $0x8] sm:$0xff]  ;;  %v426_v56 = vld [vmem:[%s870_s2] ss:$0 sm:$0xff] }
  0x29   :  { %297 = vmatpush.bf16.msrb.mxu1 %v225_v50  ;;  %278 = vmatmul.bf16.vlgmr.msra.gmra.mxu3 %v80_v4  ;;  %v385_v44 = vsel %vm324_vm0, %v376_v40, 0  ;;  %v348_v50 = vpack.c.bf16 %v346_v48, %v345_v47  ;;  %v347_v52 = vpack.c.bf16 %v344_v51, %v343_v49  ;;  %v372_v8 = vld [vmem:[%s875_s7] sm:$0xff]  ;;  %v373_v9 = vld [vmem:[%s875_s7 + $0x8] sm:$0xff] }
  0x2a   :  { %v69_v31 = vld.sshfl [vmem:[#allocation1 + $0x20] sm:$0xff pattern:$0x73625140]  ;;  %v70_v33 = vld.sshfl [vmem:[#allocation1 + $0x28] sm:$0xff pattern:$0x73625140]  ;;  %334 = vmatpush.bf16.msrb.mxu2 %v326_v38  ;;  %v375_v10 = vpack.c.bf16 %v373_v9, %v372_v8 }
  0x2b   :  { %v81_v34 = vpack.c.bf16 %v69_v31, %v69_v31  ;;  %v82_v35 = vpack.c.bf16 %v70_v33, %v70_v33  ;;  %363 = vmatpush.bf16.msrb.mxu3 %v348_v50  ;;  %v427_v11 = vld [vmem:[%s872_s4] ss:$0 sm:$0xff] }
  0x2c   :  { %285 = vmatpush.bf16.msrb.mxu0 %v216_v62  ;;  %v428_v17 = vld [vmem:[%s874_s6] ss:$0 sm:$0xff] }
  0x2d   :  { %298 = vmatpush.bf16.msrb.mxu1 %v224_v3  ;;  %v429_v23 = vld [vmem:[%s876_s8] ss:$0 sm:$0xff] }
  0x2e   :  { %335 = vmatpush.bf16.msrb.mxu2 %v314_v45 }
  0x2f   :  { %364 = vmatpush.bf16.msrb.mxu3 %v347_v52 }
  0x30   :  { %286 = vmatpush.bf16.msrb.mxu0 %v215_v6 }
  0x31   :  { %299 = vmatpush.bf16.msrb.mxu1 %v223_v7 }
  0x32   :  { %393 = vmatpush.bf16.msra.mxu2 %v385_v44 }
  0x34   :  { %287 = vmatpush.bf16.msrb.mxu0 %v214_v12 }
  0x35   :  { %300 = vmatpush.bf16.msrb.mxu1 %v222_v13 }
  0x36   :  { %394 = vmatpush.bf16.msra.mxu2 %v375_v10 }
  0x38   :  { %288 = vmatpush.bf16.msrb.mxu0 %v213_v18 }
  0x39   :  { %301 = vmatpush.bf16.msrb.mxu1 %v221_v19 }
  0x3c   :  { %289 = vmatpush.bf16.msrb.mxu0 %v212_v24 }
  0x3d   :  { %302 = vmatpush.bf16.msrb.mxu1 %v220_v25 }
  0x40   :  { %290 = vmatpush.bf16.msrb.mxu0 %v211_v30 }
  0x41   :  { %303 = vmatpush.bf16.msrb.mxu1 %v219_v32 }
  0x43   :  { %291 = vmatmul.bf16.vlgmr.msrb.gmra.mxu0 %v81_v34 }
  0x44   :  { %304 = vmatmul.bf16.vlgmr.msrb.gmra.mxu1 %v82_v35 }
  0xa0   :  { %v240_v46 = vpop.f32.mrf.mxu0 }
  0xa1   :  { %v241_v58 = vadd.f32 %v426_v56, %v240_v46 }
  0xa3   :  { %v253_v43 = vpop.f32.mrf.mxu1 }
  0xa4   :  { %v254_v60 = vadd.f32 %v253_v43, %v241_v58 }
  0xa8   :  { %v242_v55 = vpop.f32.mrf.mxu0 }
  0xaa   :  { %v266_v54 = vpop.f32.mrf.mxu2 }
  0xab   :  { %v255_v53 = vpop.f32.mrf.mxu1  ;;  %v267_v62 = vadd.f32 %v266_v54, %v254_v60 }
  0xac   :  { %v279_v57 = vpop.f32.mrf.mxu3 }
  0xad   :  { %v280_v63 = vadd.f32 %v279_v57, %v267_v62 }
  0xb2   :  { %v268_v59 = vpop.f32.mrf.mxu2 }
  0xb4   :  { %v281_v61 = vpop.f32.mrf.mxu3 }
  0xc0   :  { %v292_v0 = vpop.f32.mrf.mxu0 }
  0xc1   :  { %v293_v1 = vadd.f32 %v292_v0, %v280_v63  ;;  %v305_v2 = vpop.f32.mrf.mxu1 }
  0xc3   :  { %v306_v3 = vadd.f32 %v305_v2, %v293_v1 }
  0xc5   :  { %v309_v4 = vmax.f32 %v306_v3, 0.0 }
  0xc7   :  { %v310_v5 = vpack.c.bf16 %v309_v4, %v309_v4 }
  0xc8   :  { %v294_v6 = vpop.f32.mrf.mxu0 }
  0xc9   :  { %v307_v7 = vpop.f32.mrf.mxu1  ;;  %420 = vmatmul.msk.bf16.vlgmr.msrb.gmra.mxu2 %vm320_vm1, %v310_v5 }
 0x14c   :  { %v337_v12 = vpop.f32.mrf.mxu2 }
 0x14d   :  { %v338_v13 = vadd.f32 %v427_v11, %v337_v12 }
 0x14f   :  { %v341_v14 = vmax.f32 %v338_v13, 0.0 }
 0x151   :  { %v342_v15 = vpack.c.bf16 %v341_v14, %v341_v14 }
 0x153   :  { %421 = vmatmul.msk.bf16.vlgmr.msrb.gmra.mxu3 %vm353_vm2, %v342_v15 }
 0x154   :  { %v339_v16 = vpop.f32.mrf.mxu2 }
 0x1d6   :  { %v366_v18 = vpop.f32.mrf.mxu3 }
 0x1d7   :  { %v367_v19 = vadd.f32 %v428_v17, %v366_v18 }
 0x1d9   :  { %v370_v20 = vmax.f32 %v367_v19, 0.0 }
 0x1db   :  { %v371_v21 = vpack.c.bf16 %v370_v20, %v370_v20 }
 0x1dd   :  { %422 = vmatmul.msk.bf16.vlgmr.msra.gmra.mxu2 %vm320_vm1, %v371_v21 }
 0x1de   :  { %v368_v22 = vpop.f32.mrf.mxu3 }
 0x260   :  { %v396_v24 = vpop.f32.mrf.mxu2 }
 0x261   :  { %v397_v25 = vadd.f32 %v429_v23, %v396_v24 }
 0x263   :  { %401 = vst.msk [vmem:[#allocation2] sm:$0xff] %vm400_vm3, %v397_v25 }
 0x268   :  { %v398_v26 = vpop.f32.mrf.mxu2 }
 0x269   :  { %405 = vsyncadd [#allocation3], 96  ;;  %s408_s6 = sshll.u32 %s877_s9, 4  ;;  %s456_s1 = smov [#allocation2]   ;;  %s409_s6 = int_to_ptr.hbm [resolvable:$true] %s408_s6 }
 0x26a   :  { %s406_s28 = sshll.u32 %s456_s1, 4  ;;  %s457_s29 = smov 32   ;;  %s407_s28 = int_to_ptr.vmem [resolvable:$true] %s406_s28 }
 0x26b   :  { %s458_s30 = smov 2  }
 0x26c   :  { %414 = dma.vmem_to_hbm [thread:$0]  %s407_s28, 32, %s409_s6, [#allocation3], %s457_s29, %s457_s29, %s458_s30  }
 0x26d   :  { %454 = dma.done.wait [#allocation3], 128  }
 0x26e   :  { %455 = vsyncadd [#allocation3], 4294967168 }
 0x26f   :  { %419 = vsyncpa [#allocation3], 1 }

</bundles_post_ra>
